<compile_context>
chip_gen: v6e
topology: v6e:2x2x1
jax: 0.10.0
libtpu: 0.0.40
codegen_flags: <defaults>
</compile_context>

<pallas_src>
import numpy as np
import jax
import jax.numpy as jnp
from jax.experimental import pallas as pl
from jax.experimental.pallas import tpu as pltpu

NUM_A = 19
NUM_S = 115
H1 = 50
H2 = 30

TILE_B_MAX = 2048      # per-tile VMEM stays ~4 MiB at this size (f32 streams)


def _round_up(n, m):
    return (n + m - 1) // m * m


# ----------------------------------------------------------------------------
# Pallas kernel: full DuelingDQNet forward on one (tile_b, NUM_S) batch tile.
# Weights/biases are VMEM-resident (constant index_map), ~30 KB total.
# ----------------------------------------------------------------------------
def dueling_kernel(x_ref, w1_ref, b1_ref, w2_ref, b2_ref,
                   w3_ref, b3_ref, w4_ref, b4_ref, out_ref):
    x = x_ref[...]

    h1 = jnp.maximum(
        jnp.dot(x, w1_ref[...], preferred_element_type=jnp.float32) + b1_ref[...], 0.0)
    h2 = jnp.maximum(
        jnp.dot(h1, w2_ref[...], preferred_element_type=jnp.float32) + b2_ref[...], 0.0)

    # fused fc3_adv | fc3_val : (tile_b, 60) = [adv_hidden | val_hidden]
    h3 = jnp.maximum(
        jnp.dot(h2, w3_ref[...], preferred_element_type=jnp.float32) + b3_ref[...], 0.0)

    # fc4 with the dueling combine pre-folded into w4/b4:
    #   Q = h3 @ [W4a - mean_col(W4a) ; W4v broadcast] + (b4a - mean(b4a) + b4v)
    q = jnp.dot(h3, w4_ref[...], preferred_element_type=jnp.float32) + b4_ref[...]
    out_ref[...] = q.astype(out_ref.dtype)


# ----------------------------------------------------------------------------
# One-time parameter packing (hoisted out of the per-step forward).
# Weights are stored as (in_features, out_features) so the kernel does x @ W.
# ----------------------------------------------------------------------------
def pack_params(params, stream_dtype=jnp.float32):
    (w1, b1, w2, b2, w3a, b3a, w3v, b3v, w4a, b4a, w4v, b4v) = params

    # Fused fc3: [adv | val] hidden heads share the fc2 output.
    w3 = jnp.concatenate([w3a, w3v], axis=1)                    # (30, 60)
    b3 = jnp.concatenate([b3a, b3v], axis=1)                    # (1, 60)

    # Fold Q = val + adv - mean(adv) into fc4 (exact linear fold):
    w4a_c = w4a - jnp.mean(w4a, axis=1, keepdims=True)          # (30, 19)
    b4a_c = b4a - jnp.mean(b4a, axis=1, keepdims=True)          # (1, 19)
    w4v_rep = jnp.broadcast_to(w4v, (H2, NUM_A))                # (30, 19)
    w4 = jnp.concatenate([w4a_c, w4v_rep], axis=0)              # (60, 19)
    b4 = b4a_c + b4v                                            # (1, 19)

    cast = lambda a: a.astype(stream_dtype)
    return tuple(cast(a) for a in (w1, b1, w2, b2, w3, b3, w4, b4))


# ----------------------------------------------------------------------------
# Forward wrapper.
# ----------------------------------------------------------------------------
def dueling_dqn_forward(x, packed):
    """DuelingDQNet forward.  x: (B, NUM_S) -> Q: (B, NUM_A)."""
    w1, b1, w2, b2, w3, b3, w4, b4 = packed
    B = x.shape[0]
    x = x.astype(w1.dtype)

    # Batch tiling: no padding of x; a partial last block handles B % tile_b.
    # Keep n_tiles >= 2 for large B so v7x's two TensorCores both get work.
    if B <= 8:
        tile_b = B                      # block == full array dim (legal)
    else:
        tile_b = min(TILE_B_MAX, _round_up((B + 1) // 2, 8))
    n_tiles = -(-B // tile_b)

    def w_spec(r, c):
        return pl.BlockSpec((r, c), lambda i: (0, 0))   # VMEM-resident weights

    elem = jnp.dtype(w1.dtype).itemsize
    w_elems = (NUM_S * H1 + H1 * H2 + H2 * 2 * H2 + 2 * H2 * NUM_A
               + H1 + H2 + 2 * H2 + NUM_A)
    flops = 2 * B * (NUM_S * H1 + H1 * H2 + H2 * 2 * H2 + 2 * H2 * NUM_A)
    bytes_accessed = elem * (B * NUM_S + w_elems) + 4 * B * NUM_A

    q = pl.pallas_call(
        dueling_kernel,
        out_shape=jax.ShapeDtypeStruct((B, NUM_A), jnp.float32),
        grid=(n_tiles,),
        in_specs=[
            pl.BlockSpec((tile_b, NUM_S), lambda i: (i, 0)),   # x tile streams
            w_spec(NUM_S, H1),      w_spec(1, H1),
            w_spec(H1, H2),         w_spec(1, H2),
            w_spec(H2, 2 * H2),     w_spec(1, 2 * H2),
            w_spec(2 * H2, NUM_A),  w_spec(1, NUM_A),
        ],
        out_specs=pl.BlockSpec((tile_b, NUM_A), lambda i: (i, 0)),
        compiler_params=pltpu.CompilerParams(
            dimension_semantics=("parallel",),
            vmem_limit_bytes=32 * 1024 * 1024),
        cost_estimate=pl.CostEstimate(flops=flops, transcendentals=0,
                                      bytes_accessed=bytes_accessed),
    )(x, w1, b1, w2, b2, w3, b3, w4, b4)
    return q


# ----------------------------------------------------------------------------
# Deterministic parameter init (weights ~ N(0, 0.1) like module.init_weights;
# biases keep nn.Linear's default small uniform).
# ----------------------------------------------------------------------------
def init_params(key):
    ks = jax.random.split(key, 12)

    def w(k, fan_in, fan_out):
        return 0.1 * jax.random.normal(k, (fan_in, fan_out), jnp.float32)

    def b(k, fan_in, fan_out):
        bound = 1.0 / np.sqrt(fan_in)
        return jax.random.uniform(k, (1, fan_out), jnp.float32, -bound, bound)

    w1 = w(ks[0], NUM_S, H1);   b1 = b(ks[1], NUM_S, H1)
    w2 = w(ks[2], H1, H2);      b2 = b(ks[3], H1, H2)
    w3a = w(ks[4], H2, H2);     b3a = b(ks[5], H2, H2)
    w3v = w(ks[6], H2, H2);     b3v = b(ks[7], H2, H2)
    w4a = w(ks[8], H2, NUM_A);  b4a = b(ks[9], H2, NUM_A)
    w4v = w(ks[10], H2, 1);     b4v = b(ks[11], H2, 1)
    return (w1, b1, w2, b2, w3a, b3a, w3v, b3v, w4a, b4a, w4v, b4v)


def dueling_dqn_reference(x, params):
    """Pure-JAX reference of the DuelingDQNet forward (for correctness check)."""
    (w1, b1, w2, b2, w3a, b3a, w3v, b3v, w4a, b4a, w4v, b4v) = params
    hp = jax.lax.Precision.HIGHEST
    dot = lambda a, b_: jnp.dot(a, b_, precision=hp)
    h = jax.nn.relu(dot(x, w1) + b1)
    h = jax.nn.relu(dot(h, w2) + b2)
    adv = dot(jax.nn.relu(dot(h, w3a) + b3a), w4a) + b4a
    val = dot(jax.nn.relu(dot(h, w3v) + b3v), w4v) + b4v
    return val + adv - adv.mean(axis=1, keepdims=True)


# ----------------------------------------------------------------------------
if __name__ == "__main__":
    key = jax.random.PRNGKey(0)
    pkey, xkey = jax.random.split(key)

    params = init_params(pkey)
    packed = pack_params(params)        # one-time packing, outside the hot path

    # B=8 exercises the exact-tile path; B=13 exercises the partial last block.
    for B in (8, 13):
        x = jax.random.normal(jax.random.fold_in(xkey, B), (B, NUM_S), jnp.float32)
        q = dueling_dqn_forward(x, packed)
        jax.block_until_ready(q)

        q_ref = dueling_dqn_reference(x, params)
        assert q.shape == (B, NUM_A)
        # MXU default f32 precision + the (exact-algebra) fc4 fold: expect
        # agreement to ~1e-4 at these weight/activation scales.
        np.testing.assert_allclose(np.asarray(q), np.asarray(q_ref),
                                   rtol=1e-4, atol=2e-4)

    print("KERNEL_OK")
</pallas_src>

<mosaic_0001>
module attributes {stable_mosaic.version = 11 : i64} {
  func.func @dueling_kernel(%arg0: i32, %arg1: memref<8x115xf32, #tpu.memory_space<vmem>>, %arg2: memref<115x50xf32, #tpu.memory_space<vmem>>, %arg3: memref<1x50xf32, #tpu.memory_space<vmem>>, %arg4: memref<50x30xf32, #tpu.memory_space<vmem>>, %arg5: memref<1x30xf32, #tpu.memory_space<vmem>>, %arg6: memref<30x60xf32, #tpu.memory_space<vmem>>, %arg7: memref<1x60xf32, #tpu.memory_space<vmem>>, %arg8: memref<60x19xf32, #tpu.memory_space<vmem>>, %arg9: memref<1x19xf32, #tpu.memory_space<vmem>>, %arg10: memref<8x19xf32, #tpu.memory_space<vmem>>) attributes {dimension_semantics = [#tpu.dimension_semantics<parallel>], iteration_bounds = array<i64: 1>, scalar_prefetch = 0 : i64, scratch_operands = 0 : i64, tpu.core_type = #tpu.core_type<tc>, window_params = [{transform_indices = @transform_0, window_bounds = array<i64: 8, 115>}, {pipeline_mode = #tpu.pipeline_mode<synchronous>, transform_indices = @transform_1, window_bounds = array<i64: 115, 50>}, {pipeline_mode = #tpu.pipeline_mode<synchronous>, transform_indices = @transform_2, window_bounds = array<i64: 1, 50>}, {pipeline_mode = #tpu.pipeline_mode<synchronous>, transform_indices = @transform_3, window_bounds = array<i64: 50, 30>}, {pipeline_mode = #tpu.pipeline_mode<synchronous>, transform_indices = @transform_4, window_bounds = array<i64: 1, 30>}, {pipeline_mode = #tpu.pipeline_mode<synchronous>, transform_indices = @transform_5, window_bounds = array<i64: 30, 60>}, {pipeline_mode = #tpu.pipeline_mode<synchronous>, transform_indices = @transform_6, window_bounds = array<i64: 1, 60>}, {pipeline_mode = #tpu.pipeline_mode<synchronous>, transform_indices = @transform_7, window_bounds = array<i64: 60, 19>}, {pipeline_mode = #tpu.pipeline_mode<synchronous>, transform_indices = @transform_8, window_bounds = array<i64: 1, 19>}, {transform_indices = @transform_9, window_bounds = array<i64: 8, 19>}]} {
    %c0 = arith.constant 0 : index
    %c0_0 = arith.constant 0 : index
    %0 = vector.load %arg1[%c0, %c0_0] : memref<8x115xf32, #tpu.memory_space<vmem>>, vector<8x115xf32>
    %c0_1 = arith.constant 0 : index
    %c0_2 = arith.constant 0 : index
    %1 = vector.load %arg2[%c0_1, %c0_2] : memref<115x50xf32, #tpu.memory_space<vmem>>, vector<115x50xf32>
    %cst = arith.constant dense<0.000000e+00> : vector<8x50xf32>
    %2 = tpu.matmul %0, %1, %cst {dimension_numbers = #tpu.dot_dimension_numbers<[1], [0], [0], [1], [0, 0, 1, 1], [], []>} : vector<8x115xf32>, vector<115x50xf32>, vector<8x50xf32> -> vector<8x50xf32>
    %c0_3 = arith.constant 0 : index
    %c0_4 = arith.constant 0 : index
    %3 = vector.load %arg3[%c0_3, %c0_4] : memref<1x50xf32, #tpu.memory_space<vmem>>, vector<1x50xf32>
    %4 = vector.broadcast %3 : vector<1x50xf32> to vector<8x50xf32>
    %5 = arith.addf %2, %4 : vector<8x50xf32>
    %cst_5 = arith.constant 0.000000e+00 : f32
    %6 = vector.broadcast %cst_5 : f32 to vector<8x50xf32>
    %7 = arith.maximumf %5, %6 : vector<8x50xf32>
    %c0_6 = arith.constant 0 : index
    %c0_7 = arith.constant 0 : index
    %8 = vector.load %arg4[%c0_6, %c0_7] : memref<50x30xf32, #tpu.memory_space<vmem>>, vector<50x30xf32>
    %cst_8 = arith.constant dense<0.000000e+00> : vector<8x30xf32>
    %9 = tpu.matmul %7, %8, %cst_8 {dimension_numbers = #tpu.dot_dimension_numbers<[1], [0], [0], [1], [0, 0, 1, 1], [], []>} : vector<8x50xf32>, vector<50x30xf32>, vector<8x30xf32> -> vector<8x30xf32>
    %c0_9 = arith.constant 0 : index
    %c0_10 = arith.constant 0 : index
    %10 = vector.load %arg5[%c0_9, %c0_10] : memref<1x30xf32, #tpu.memory_space<vmem>>, vector<1x30xf32>
    %11 = vector.broadcast %10 : vector<1x30xf32> to vector<8x30xf32>
    %12 = arith.addf %9, %11 : vector<8x30xf32>
    %cst_11 = arith.constant 0.000000e+00 : f32
    %13 = vector.broadcast %cst_11 : f32 to vector<8x30xf32>
    %14 = arith.maximumf %12, %13 : vector<8x30xf32>
    %c0_12 = arith.constant 0 : index
    %c0_13 = arith.constant 0 : index
    %15 = vector.load %arg6[%c0_12, %c0_13] : memref<30x60xf32, #tpu.memory_space<vmem>>, vector<30x60xf32>
    %cst_14 = arith.constant dense<0.000000e+00> : vector<8x60xf32>
    %16 = tpu.matmul %14, %15, %cst_14 {dimension_numbers = #tpu.dot_dimension_numbers<[1], [0], [0], [1], [0, 0, 1, 1], [], []>} : vector<8x30xf32>, vector<30x60xf32>, vector<8x60xf32> -> vector<8x60xf32>
    %c0_15 = arith.constant 0 : index
    %c0_16 = arith.constant 0 : index
    %17 = vector.load %arg7[%c0_15, %c0_16] : memref<1x60xf32, #tpu.memory_space<vmem>>, vector<1x60xf32>
    %18 = vector.broadcast %17 : vector<1x60xf32> to vector<8x60xf32>
    %19 = arith.addf %16, %18 : vector<8x60xf32>
    %cst_17 = arith.constant 0.000000e+00 : f32
    %20 = vector.broadcast %cst_17 : f32 to vector<8x60xf32>
    %21 = arith.maximumf %19, %20 : vector<8x60xf32>
    %c0_18 = arith.constant 0 : index
    %c0_19 = arith.constant 0 : index
    %22 = vector.load %arg8[%c0_18, %c0_19] : memref<60x19xf32, #tpu.memory_space<vmem>>, vector<60x19xf32>
    %cst_20 = arith.constant dense<0.000000e+00> : vector<8x19xf32>
    %23 = tpu.matmul %21, %22, %cst_20 {dimension_numbers = #tpu.dot_dimension_numbers<[1], [0], [0], [1], [0, 0, 1, 1], [], []>} : vector<8x60xf32>, vector<60x19xf32>, vector<8x19xf32> -> vector<8x19xf32>
    %c0_21 = arith.constant 0 : index
    %c0_22 = arith.constant 0 : index
    %24 = vector.load %arg9[%c0_21, %c0_22] : memref<1x19xf32, #tpu.memory_space<vmem>>, vector<1x19xf32>
    %25 = vector.broadcast %24 : vector<1x19xf32> to vector<8x19xf32>
    %26 = arith.addf %23, %25 : vector<8x19xf32>
    %c0_23 = arith.constant 0 : index
    %c0_24 = arith.constant 0 : index
    %27 = vector.load %arg10[%c0_23, %c0_24] : memref<8x19xf32, #tpu.memory_space<vmem>>, vector<8x19xf32>
    tpu.vector_store %arg10[%c0_23, %c0_24], %26 {strides = array<i32>} : memref<8x19xf32, #tpu.memory_space<vmem>>, vector<8x19xf32>,
    return
  }
  func.func @transform_0(%arg0: i32) -> (i32, i32) {
    %c0_i32 = arith.constant 0 : i32
    %c0_i32_0 = arith.constant 0 : i32
    return %arg0, %c0_i32 : i32, i32
  }
  func.func @transform_1(%arg0: i32) -> (i32, i32) {
    %c0_i32 = arith.constant 0 : i32
    %c0_i32_0 = arith.constant 0 : i32
    %c0_i32_1 = arith.constant 0 : i32
    return %c0_i32, %c0_i32_0 : i32, i32
  }
  func.func @transform_2(%arg0: i32) -> (i32, i32) {
    %c0_i32 = arith.constant 0 : i32
    %c0_i32_0 = arith.constant 0 : i32
    %c0_i32_1 = arith.constant 0 : i32
    return %c0_i32, %c0_i32_0 : i32, i32
  }
  func.func @transform_3(%arg0: i32) -> (i32, i32) {
    %c0_i32 = arith.constant 0 : i32
    %c0_i32_0 = arith.constant 0 : i32
    %c0_i32_1 = arith.constant 0 : i32
    return %c0_i32, %c0_i32_0 : i32, i32
  }
  func.func @transform_4(%arg0: i32) -> (i32, i32) {
    %c0_i32 = arith.constant 0 : i32
    %c0_i32_0 = arith.constant 0 : i32
    %c0_i32_1 = arith.constant 0 : i32
    return %c0_i32, %c0_i32_0 : i32, i32
  }
  func.func @transform_5(%arg0: i32) -> (i32, i32) {
    %c0_i32 = arith.constant 0 : i32
    %c0_i32_0 = arith.constant 0 : i32
    %c0_i32_1 = arith.constant 0 : i32
    return %c0_i32, %c0_i32_0 : i32, i32
  }
  func.func @transform_6(%arg0: i32) -> (i32, i32) {
    %c0_i32 = arith.constant 0 : i32
    %c0_i32_0 = arith.constant 0 : i32
    %c0_i32_1 = arith.constant 0 : i32
    return %c0_i32, %c0_i32_0 : i32, i32
  }
  func.func @transform_7(%arg0: i32) -> (i32, i32) {
    %c0_i32 = arith.constant 0 : i32
    %c0_i32_0 = arith.constant 0 : i32
    %c0_i32_1 = arith.constant 0 : i32
    return %c0_i32, %c0_i32_0 : i32, i32
  }
  func.func @transform_8(%arg0: i32) -> (i32, i32) {
    %c0_i32 = arith.constant 0 : i32
    %c0_i32_0 = arith.constant 0 : i32
    %c0_i32_1 = arith.constant 0 : i32
    return %c0_i32, %c0_i32_0 : i32, i32
  }
  func.func @transform_9(%arg0: i32) -> (i32, i32) {
    %c0_i32 = arith.constant 0 : i32
    %c0_i32_0 = arith.constant 0 : i32
    return %arg0, %c0_i32 : i32, i32
  }
}

</mosaic_0001>

<bundles_post_ra>
// kernel: tpu_custom_call.1
= control target key start
LH: loop header
LB: loop body
LE: loop exit
PB: predicated region body
PF: predicated region fallthrough
CT: control target
= control target key end

     0   :  { %vm60_vm0 = vcmask 1042432   ;;  %v582_v1 = vmov 0.0   ;;  %vm583_vm1 = vmmov 0   ;;  %vm153_vm2 = vcmask 1041408   ;;  %s797_s0 = inlined_call_operand.vmem [shape: f32[8,115], index: 0, kind: input, shape index: {}]   ;;  %s798_s1 = inlined_call_operand.vmem [shape: f32[115,50], index: 1, kind: input, shape index: {}]   ;;  %s799_s2 = inlined_call_operand.vmem [shape: f32[1,50], index: 2, kind: input, shape index: {}]   ;;  %s800_s3 = inlined_call_operand.vmem [shape: f32[50,30], index: 3, kind: input, shape index: {}]   ;;  %s801_s4 = inlined_call_operand.vmem [shape: f32[1,30], index: 4, kind: input, shape index: {}]   ;;  %s802_s5 = inlined_call_operand.vmem [shape: f32[30,60], index: 5, kind: input, shape index: {}]   ;;  %s803_s6 = inlined_call_operand.vmem [shape: f32[1,60], index: 6, kind: input, shape index: {}]   ;;  %s804_s7 = inlined_call_operand.vmem [shape: f32[60,19], index: 7, kind: input, shape index: {}]   ;;  %s805_s8 = inlined_call_operand.vmem [shape: f32[1,19], index: 8, kind: input, shape index: {}]   ;;  %s806_s9 = inlined_call_operand.hbm [shape: f32[8,19], index: 9, kind: output, shape index: {}]  }
   0x1   :  { %v48_v0 = vld [vmem:[%s798_s1 + $0x70] sm:$0x7]  ;;  %477 = vmatprep.subr.mxu0 %v582_v1  ;;  %v47_v2 = vld [vmem:[%s798_s1 + $0x68] sm:$0xff]  ;;  %510 = vmatprep.subr.mxu1 %v582_v1  ;;  %v46_v3 = vld [vmem:[%s798_s1 + $0x60] sm:$0xff] }
   0x2   :  { %478 = vmatpush3.msk.msra.mxu0 %vm60_vm0, %v48_v0  ;;  %507 = vmatprep.mubr.msk.f32.mxu0 %vm583_vm1, %v582_v1  ;;  %v45_v4 = vld [vmem:[%s798_s1 + $0x58] sm:$0xff]  ;;  %v141_v5 = vld [vmem:[%s800_s3 + $0x30] sm:$0x3]  ;;  %v140_v6 = vld [vmem:[%s800_s3 + $0x28] sm:$0xff] }
   0x3   :  { %479 = vmatprep.subr.mxu0 %v582_v1  ;;  %524 = vmatprep.mubr.msk.f32.mxu1 %vm583_vm1, %v582_v1  ;;  %v44_v7 = vld [vmem:[%s798_s1 + $0x50] sm:$0xff]  ;;  %v139_v8 = vld [vmem:[%s800_s3 + $0x20] sm:$0xff] }
   0x4   :  { %480 = vmatpush3.msra.mxu0 %v47_v2  ;;  %511 = vmatpush3.msk.msra.mxu1 %vm153_vm2, %v141_v5 }
   0x5   :  { %481 = vmatprep.subr.mxu0 %v582_v1  ;;  %512 = vmatprep.subr.mxu1 %v582_v1 }
   0x6   :  { %482 = vmatpush3.msra.mxu0 %v46_v3 }
   0x7   :  { %483 = vmatprep.subr.mxu0 %v582_v1 }
   0x8   :  { %14 = vsyncpa [#allocation3], 0  ;;  %484 = vmatpush3.msra.mxu0 %v45_v4  ;;  %513 = vmatpush3.msra.mxu1 %v140_v6  ;;  %v43_v9 = vld [vmem:[%s798_s1 + $0x48] sm:$0xff]  ;;  %v138_v10 = vld [vmem:[%s800_s3 + $0x18] sm:$0xff]  ;;  %vm56_vm3 = vcmask 941056   ;;  %vm149_vm4 = vcmask 408576  }
   0x9   :  { %485 = vmatprep.subr.mxu0 %v582_v1  ;;  %514 = vmatprep.subr.mxu1 %v582_v1  ;;  %v42_v11 = vld [vmem:[%s798_s1 + $0x40] sm:$0xff]  ;;  %v41_v12 = vld [vmem:[%s798_s1 + $0x38] sm:$0xff]  ;;  %v40_v13 = vld [vmem:[%s798_s1 + $0x30] sm:$0xff]  ;;  %vm243_vm5 = vcmask 1045504   ;;  %vm239_vm6 = vcmask 244736   ;;  %vm337_vm7 = vcmask 1043456  }
   0xa   :  { %486 = vmatpush3.msra.mxu0 %v44_v7  ;;  %515 = vmatpush3.msra.mxu1 %v139_v8  ;;  %v39_v14 = vld [vmem:[%s798_s1 + $0x28] sm:$0xff]  ;;  %v38_v15 = vld [vmem:[%s798_s1 + $0x20] sm:$0xff]  ;;  %v37_v16 = vld [vmem:[%s798_s1 + $0x18] sm:$0xff]  ;;  %vm333_vm8 = vcmask 490496   ;;  %s584_s15 = smov [#allocation2]   ;;  %vm411_vm9 = vcmask 154624  }
   0xb   :  { %487 = vmatprep.subr.mxu0 %v582_v1  ;;  %516 = vmatprep.subr.mxu1 %v582_v1  ;;  %v36_v17 = vld [vmem:[%s798_s1 + $0x10] sm:$0xff]  ;;  %v35_v18 = vld [vmem:[%s798_s1 + $0x8] sm:$0xff]  ;;  %v34_v19 = vld [vmem:[%s798_s1] sm:$0xff] }
   0xc   :  { %488 = vmatpush3.msra.mxu0 %v43_v9  ;;  %517 = vmatpush3.msra.mxu1 %v138_v10  ;;  %v33_v20 = vld [vmem:[%s797_s0] sm:$0xff]  ;;  %v137_v21 = vld [vmem:[%s800_s3 + $0x10] sm:$0xff]  ;;  %v136_v22 = vld [vmem:[%s800_s3 + $0x8] sm:$0xff] }
   0xd   :  { %489 = vmatprep.subr.mxu0 %v582_v1  ;;  %518 = vmatprep.subr.mxu1 %v582_v1  ;;  %v135_v23 = vld [vmem:[%s800_s3] sm:$0xff]  ;;  %v231_v29 = vld [vmem:[%s802_s5 + $0x18] sm:$0x3f]  ;;  %v230_v30 = vld [vmem:[%s802_s5 + $0x10] sm:$0xff] }
   0xe   :  { %490 = vmatpush3.msra.mxu0 %v42_v11  ;;  %519 = vmatpush3.msra.mxu1 %v137_v21  ;;  %v427_v24 = vld [vmem:[%s799_s2] ss:$0 sm:$0xff]  ;;  %v229_v31 = vld [vmem:[%s802_s5 + $0x8] sm:$0xff]  ;;  %v325_v38 = vld [vmem:[%s804_s7 + $0x38] sm:$0xf]  ;;  %s419_s2 = sshll.u32 %s584_s15, 4  ;;  %s420_s2 = int_to_ptr.vmem [resolvable:$true] %s419_s2 }
   0xf   :  { %491 = vmatprep.subr.mxu0 %v582_v1  ;;  %520 = vmatprep.subr.mxu1 %v582_v1  ;;  %v228_v32 = vld [vmem:[%s802_s5] sm:$0xff]  ;;  %v324_v39 = vld [vmem:[%s804_s7 + $0x30] sm:$0xff]  ;;  %v323_v40 = vld [vmem:[%s804_s7 + $0x28] sm:$0xff]  ;;  %p565_p1 = scmp.lt.s32.totalorder %s420_s2, %s420_s2 }
  0x10   :  { %492 = vmatpush3.msra.mxu0 %v41_v12  ;;  %521 = vmatpush3.msra.mxu1 %v136_v22  ;;  %v430_v33 = vld [vmem:[%s801_s4] ss:$0 sm:$0xff]  ;;  %v321_v42 = vld [vmem:[%s804_s7 + $0x18] sm:$0xff]  ;;  %v320_v43 = vld [vmem:[%s804_s7 + $0x10] sm:$0xff] }
  0x11   :  { %493 = vmatprep.subr.mxu0 %v582_v1  ;;  %522 = vmatprep.subr.mxu1 %v582_v1  ;;  %v322_v41 = vld [vmem:[%s804_s7 + $0x20] sm:$0xff]  ;;  %v319_v44 = vld [vmem:[%s804_s7 + $0x8] sm:$0xff] }
  0x12   :  { %494 = vmatpush3.msra.mxu0 %v40_v13  ;;  %523 = vmatpush3.msra.mxu1 %v135_v23  ;;  %v318_v45 = vld [vmem:[%s804_s7] sm:$0xff]  ;;  %s560_s7 = scalar_lea.vmem %s420_s2, 128 }
  0x13   :  { %495 = vmatprep.subr.mxu0 %v582_v1  ;;  %527 = vmatprep.subr.mxu1 %v582_v1  ;;  %v433_v46 = vld [vmem:[%s803_s6] ss:$0 sm:$0xff]  ;;  %p561_p0 = scmp.ne.s32.totalorder %s420_s2, %s560_s7  ;;  %p566_p2 = scmp.lt.s32.totalorder %s560_s7, %s560_s7 }
  0x14   :  { %496 = vmatpush3.msra.mxu0 %v39_v14  ;;  %v436_v51 = vld [vmem:[%s805_s8] ss:$0 sm:$0xff] }
  0x15   :  { %497 = vmatprep.subr.mxu0 %v582_v1  ;;  %p567_p3 = por %p566_p2, %p565_p1 }
  0x16   :  { %498 = vmatpush3.msra.mxu0 %v38_v15 }
  0x17   :  { %499 = vmatprep.subr.mxu0 %v582_v1  ;;  %p568_p4 = pnand %p567_p3, %p561_p0 }
  0x18   :  { %500 = vmatpush3.msra.mxu0 %v37_v16 }
  0x19   :  { %501 = vmatprep.subr.mxu0 %v582_v1 }
  0x1a   :  { %502 = vmatpush3.msra.mxu0 %v36_v17 }
  0x1b   :  { %503 = vmatprep.subr.mxu0 %v582_v1 }
  0x1c   :  { %504 = vmatpush3.msra.mxu0 %v35_v18 }
  0x1d   :  { %505 = vmatprep.subr.mxu0 %v582_v1 }
  0x1e   :  { %506 = vmatpush3.msra.mxu0 %v34_v19 }
  0x1f   :  { %508 = vmatmul.mubr.msk.f32.vlgmr.msra.gmra.mxu0 %vm56_vm3, %v33_v20 }
  0xdf   :  { %v130_v25 = vpop.f32.mrf.mxu0 }
  0xe0   :  { %v131_v26 = vadd.f32 %v427_v24, %v130_v25 }
  0xe1   :  { %v509_v27 = vpop.f32.mrf.mxu0 }
  0xe2   :  { %v134_v28 = vmax.f32 %v131_v26, 0.0 }
  0xe4   :  { %525 = vmatmul.mubr.msk.f32.vlgmr.msra.gmra.mxu1 %vm149_vm4, %v134_v28 }
  0xe5   :  { %528 = vmatpush3.msk.msra.mxu1 %vm243_vm5, %v231_v29  ;;  %535 = vmatprep.mubr.msk.f32.mxu1 %vm583_vm1, %v582_v1 }
  0xe6   :  { %529 = vmatprep.subr.mxu1 %v582_v1 }
  0xe7   :  { %530 = vmatpush3.msra.mxu1 %v230_v30 }
  0xe8   :  { %531 = vmatprep.subr.mxu1 %v582_v1 }
  0xe9   :  { %532 = vmatpush3.msra.mxu1 %v229_v31 }
  0xea   :  { %533 = vmatprep.subr.mxu1 %v582_v1 }
  0xeb   :  { %534 = vmatpush3.msra.mxu1 %v228_v32 }
  0xec   :  { %538 = vmatprep.subr.mxu1 %v582_v1 }
 0x1a4   :  { %v223_v34 = vpop.f32.mrf.mxu1 }
 0x1a5   :  { %v224_v35 = vadd.f32 %v430_v33, %v223_v34 }
 0x1a6   :  { %v526_v36 = vpop.f32.mrf.mxu1 }
 0x1a7   :  { %v227_v37 = vmax.f32 %v224_v35, 0.0 }
 0x1a9   :  { %536 = vmatmul.mubr.msk.f32.vlgmr.msra.gmra.mxu1 %vm239_vm6, %v227_v37 }
 0x1aa   :  { %539 = vmatpush3.msk.msra.mxu1 %vm337_vm7, %v325_v38  ;;  %554 = vmatprep.mubr.msk.f32.mxu1 %vm583_vm1, %v582_v1 }
 0x1ab   :  { %540 = vmatprep.subr.mxu1 %v582_v1 }
 0x1ac   :  { %541 = vmatpush3.msra.mxu1 %v324_v39 }
 0x1ad   :  { %542 = vmatprep.subr.mxu1 %v582_v1 }
 0x1ae   :  { %543 = vmatpush3.msra.mxu1 %v323_v40 }
 0x1af   :  { %544 = vmatprep.subr.mxu1 %v582_v1 }
 0x1b0   :  { %545 = vmatpush3.msra.mxu1 %v322_v41 }
 0x1b1   :  { %546 = vmatprep.subr.mxu1 %v582_v1 }
 0x1b2   :  { %547 = vmatpush3.msra.mxu1 %v321_v42 }
 0x1b3   :  { %548 = vmatprep.subr.mxu1 %v582_v1 }
 0x1b4   :  { %549 = vmatpush3.msra.mxu1 %v320_v43 }
 0x1b5   :  { %550 = vmatprep.subr.mxu1 %v582_v1 }
 0x1b6   :  { %551 = vmatpush3.msra.mxu1 %v319_v44 }
 0x1b7   :  { %552 = vmatprep.subr.mxu1 %v582_v1 }
 0x1b8   :  { %553 = vmatpush3.msra.mxu1 %v318_v45 }
 0x269   :  { %v313_v47 = vpop.f32.mrf.mxu1 }
 0x26a   :  { %v314_v48 = vadd.f32 %v433_v46, %v313_v47 }
 0x26b   :  { %v537_v49 = vpop.f32.mrf.mxu1 }
 0x26c   :  { %v317_v50 = vmax.f32 %v314_v48, 0.0 }
 0x26e   :  { %555 = vmatmul.mubr.msk.f32.vlgmr.msra.gmra.mxu1 %vm333_vm8, %v317_v50 }
 0x32e   :  { %v407_v52 = vpop.f32.mrf.mxu1 }
 0x32f   :  { %v408_v53 = vadd.f32 %v436_v51, %v407_v52 }
 0x330   :  { %v556_v54 = vpop.f32.mrf.mxu1 }
 0x331   :  { %412 = vst.msk [vmem:[#allocation2] sm:$0xff] %vm411_vm9, %v408_v53 }
 0x332   :  { %571 = shalt.err (!%p568_p4)
}
 0x333   :  { %422 = dma.vmem_to_hbm [thread:$0]  %s420_s2, 128, %s806_s9, [#allocation3]  }
 0x334   :  { %580 = dma.done.wait [#allocation3], 128  }
 0x335   :  { %581 = vsyncadd [#allocation3], 4294967168 }
 0x336   :  { %426 = vsyncpa [#allocation3], 1 }

</bundles_post_ra>
